<compile_context>
chip_gen: v7x
topology: tpu7x:2x2x1
jax: 0.10.0
libtpu: 0.0.40
codegen_flags: <defaults>
</compile_context>

<pallas_src>
import jax
import jax.numpy as jnp
from jax.experimental import pallas as pl
from jax.experimental.pallas import tpu as pltpu


def _round_up(x, m):
    return (x + m - 1) // m * m


def _pick_tile(batch, fields, tile_b):
    """Pick a lane-dense batch tile (multiple of 128) that fits VMEM."""
    # Double-buffered working set: (fields in + 1 out) rows * 4 B/lane * 2 bufs.
    # Keep it under ~12 MiB so it fits v5e's 16 MiB default scoped VMEM
    # (v6e/v7x have 32 MiB default scoped, so they fit a fortiori).
    budget_bytes = 12 << 20
    per_lane_bytes = (fields + 1) * 4 * 2
    tb_budget = max(128, (budget_bytes // per_lane_bytes) // 128 * 128)
    tb = min(_round_up(max(tile_b, 1), 128), tb_budget, _round_up(batch, 128))
    # Prefer >= 2 grid steps when the batch allows it, so both v7x TensorCores
    # get work under dimension_semantics=("parallel",).
    if batch > 256 and batch <= tb:
        tb = max(128, _round_up(pl.cdiv(batch, 2), 128))
    return tb


# ----------------------------------------------------------------------------
# Pallas kernels: one batch tile (batch on lanes, fields on sublanes).
# ----------------------------------------------------------------------------
def _linear_kernel_cat_num(cat_ref, num_ref, numw_ref, bias_ref, out_ref):
    """
    cat_ref : (Fc, TB) f32 VMEM  gathered categorical linear weights
    num_ref : (Fn, TB) f32 VMEM  numerical features (field-major)
    numw_ref: (Fn,)    f32 SMEM  numerical linear weights (scalars)
    bias_ref: (1,)     f32 SMEM  scalar bias
    out_ref : (1, TB)  f32       lane-dense output row
    """
    fc = cat_ref.shape[0]
    fn = num_ref.shape[0]
    acc = cat_ref[0:1, :]
    for f in range(1, fc):                      # statically unrolled VPU adds
        acc = acc + cat_ref[f:f + 1, :]
    for j in range(fn):                         # scalar-broadcast FMAs
        acc = acc + num_ref[j:j + 1, :] * numw_ref[j]
    out_ref[...] = acc + bias_ref[0]


def _linear_kernel_cat_only(cat_ref, bias_ref, out_ref):
    fc = cat_ref.shape[0]
    acc = cat_ref[0:1, :]
    for f in range(1, fc):
        acc = acc + cat_ref[f:f + 1, :]
    out_ref[...] = acc + bias_ref[0]


# ----------------------------------------------------------------------------
# Wrapper: field-major embedding gather (glue) + pallas_call.
# ----------------------------------------------------------------------------
def linear_model_forward(params, cat_features, num_features=None, *, tile_b=32768):
    B, Fc = cat_features.shape

    # TODO(synk): the data-dependent nn.Embedding row gather stays in XLA glue
    # (fusing it in-kernel needs a dynamic VMEM gather / one-hot matmul that is
    # only worthwhile for small vocabularies). The gather is emitted directly
    # in field-major (Fc, B) layout so no separate transpose pass is needed.
    table = params["cat_linear"][:, 0].astype(jnp.float32)        # (V,)
    cat_t = jnp.take(table, cat_features.T, axis=0)               # (Fc, B)
    bias_sc = params["bias"].reshape(1).astype(jnp.float32)       # (1,) SMEM

    has_num = num_features is not None
    if has_num:
        num_t = num_features.astype(jnp.float32).T                # (Fn, B)
        num_w = params["num_linear"].reshape(-1).astype(jnp.float32)  # (Fn,)
        Fn = num_t.shape[0]
        fields = Fc + Fn
    else:
        fields = Fc

    tb = _pick_tile(B, fields, tile_b)
    grid = pl.cdiv(B, tb)
    n_pad = grid * tb   # output buffer padded to whole tiles: unmasked stores

    cost = pl.CostEstimate(
        flops=2 * fields * B,
        transcendentals=0,
        bytes_accessed=(fields + 1) * B * 4,
    )
    cparams = pltpu.CompilerParams(dimension_semantics=("parallel",))

    if has_num:
        out = pl.pallas_call(
            _linear_kernel_cat_num,
            out_shape=jax.ShapeDtypeStruct((1, n_pad), jnp.float32),
            grid=(grid,),
            in_specs=[
                pl.BlockSpec((Fc, tb), lambda i: (0, i)),            # batch-tiled
                pl.BlockSpec((Fn, tb), lambda i: (0, i)),            # batch-tiled
                pl.BlockSpec(memory_space=pltpu.MemorySpace.SMEM),   # num weights
                pl.BlockSpec(memory_space=pltpu.MemorySpace.SMEM),   # bias
            ],
            out_specs=pl.BlockSpec((1, tb), lambda i: (0, i)),       # lane-dense
            compiler_params=cparams,
            cost_estimate=cost,
        )(cat_t, num_t, num_w, bias_sc)
    else:
        out = pl.pallas_call(
            _linear_kernel_cat_only,
            out_shape=jax.ShapeDtypeStruct((1, n_pad), jnp.float32),
            grid=(grid,),
            in_specs=[
                pl.BlockSpec((Fc, tb), lambda i: (0, i)),
                pl.BlockSpec(memory_space=pltpu.MemorySpace.SMEM),
            ],
            out_specs=pl.BlockSpec((1, tb), lambda i: (0, i)),
            compiler_params=cparams,
            cost_estimate=cost,
        )(cat_t, bias_sc)

    return out[0, :B].reshape(B, 1)


# ----------------------------------------------------------------------------
# Plain-JAX reference (mirrors the PyTorch forward exactly).
# ----------------------------------------------------------------------------
def linear_model_reference(params, cat_features, num_features=None):
    lw = jnp.take(params["cat_linear"], cat_features, axis=0)                  # (B, Fc, 1)
    if num_features is not None:
        nlw = jnp.einsum("ik,jk->ikj", num_features, params["num_linear"])     # (B, Fn, 1)
        lw = jnp.concatenate([lw, nlw], axis=1)
    return jnp.sum(lw, axis=1) + params["bias"]                                # (B, 1)


# ----------------------------------------------------------------------------
# Deterministic parameter init (shapes follow the PyTorch __init__).
# ----------------------------------------------------------------------------
def init_params(key, num_categorical, num_numerical):
    k1, k2 = jax.random.split(key)
    # nn.Embedding default init ~ N(0, 1); xavier_uniform for num_linear.
    a = jnp.sqrt(6.0 / (num_numerical + 1))
    return {
        "cat_linear": jax.random.normal(k1, (num_categorical, 1), jnp.float32),
        "num_linear": jax.random.uniform(k2, (1, num_numerical), jnp.float32, -a, a),
        "bias": jnp.zeros((1,), jnp.float32),
    }


if __name__ == "__main__":
    num_categorical = 16   # embedding vocab
    num_numerical = 2      # numerical features
    Fc = 3                 # categorical fields per example
    B = 8                  # batch

    key = jax.random.PRNGKey(0)
    kp, kc, kn = jax.random.split(key, 3)
    params = init_params(kp, num_categorical, num_numerical)

    cat_features = jax.random.randint(kc, (B, Fc), 0, num_categorical, jnp.int32)
    num_features = jax.random.normal(kn, (B, num_numerical), jnp.float32)

    # Path with numerical features.
    out = linear_model_forward(params, cat_features, num_features)
    out = jax.block_until_ready(out)
    ref = linear_model_reference(params, cat_features, num_features)
    assert out.shape == (B, 1)
    assert bool(jnp.all(jnp.isfinite(out)))
    assert bool(jnp.allclose(out, ref, rtol=1e-5, atol=1e-5)), (out, ref)

    # Categorical-only path (specialized kernel, no fabricated zero stream).
    out2 = jax.block_until_ready(linear_model_forward(params, cat_features, None))
    ref2 = linear_model_reference(params, cat_features, None)
    assert out2.shape == (B, 1)
    assert bool(jnp.allclose(out2, ref2, rtol=1e-5, atol=1e-5)), (out2, ref2)

    print("KERNEL_OK")
</pallas_src>

<mosaic_0001>
module attributes {stable_mosaic.version = 11 : i64} {
  func.func @_linear_kernel_cat_num(%arg0: i32, %arg1: memref<3x128xf32, #tpu.memory_space<vmem>>, %arg2: memref<2x128xf32, #tpu.memory_space<vmem>>, %arg3: memref<2xf32, #tpu.memory_space<smem>>, %arg4: memref<1xf32, #tpu.memory_space<smem>>, %arg5: memref<1x128xf32, #tpu.memory_space<vmem>>) attributes {dimension_semantics = [#tpu.dimension_semantics<parallel>], iteration_bounds = array<i64: 1>, scalar_prefetch = 0 : i64, scratch_operands = 0 : i64, tpu.core_type = #tpu.core_type<tc>, window_params = [{transform_indices = @transform_0, window_bounds = array<i64: 3, 128>}, {transform_indices = @transform_1, window_bounds = array<i64: 2, 128>}, {transform_indices = @transform_2, window_bounds = array<i64: 2>}, {transform_indices = @transform_3, window_bounds = array<i64: 1>}, {transform_indices = @transform_4, window_bounds = array<i64: 1, 128>}]} {
    %c0 = arith.constant 0 : index
    %c0_0 = arith.constant 0 : index
    %0 = vector.load %arg1[%c0, %c0_0] : memref<3x128xf32, #tpu.memory_space<vmem>>, vector<1x128xf32>
    %c1 = arith.constant 1 : index
    %c0_1 = arith.constant 0 : index
    %1 = vector.load %arg1[%c1, %c0_1] : memref<3x128xf32, #tpu.memory_space<vmem>>, vector<1x128xf32>
    %2 = arith.addf %0, %1 : vector<1x128xf32>
    %c2 = arith.constant 2 : index
    %c0_2 = arith.constant 0 : index
    %3 = vector.load %arg1[%c2, %c0_2] : memref<3x128xf32, #tpu.memory_space<vmem>>, vector<1x128xf32>
    %4 = arith.addf %2, %3 : vector<1x128xf32>
    %c0_3 = arith.constant 0 : index
    %c0_4 = arith.constant 0 : index
    %5 = vector.load %arg2[%c0_3, %c0_4] : memref<2x128xf32, #tpu.memory_space<vmem>>, vector<1x128xf32>
    %c0_5 = arith.constant 0 : index
    %6 = memref.load %arg3[%c0_5] : memref<2xf32, #tpu.memory_space<smem>>
    %7 = vector.broadcast %6 : f32 to vector<1x128xf32>
    %8 = arith.mulf %5, %7 : vector<1x128xf32>
    %9 = arith.addf %4, %8 : vector<1x128xf32>
    %c1_6 = arith.constant 1 : index
    %c0_7 = arith.constant 0 : index
    %10 = vector.load %arg2[%c1_6, %c0_7] : memref<2x128xf32, #tpu.memory_space<vmem>>, vector<1x128xf32>
    %c1_8 = arith.constant 1 : index
    %11 = memref.load %arg3[%c1_8] : memref<2xf32, #tpu.memory_space<smem>>
    %12 = vector.broadcast %11 : f32 to vector<1x128xf32>
    %13 = arith.mulf %10, %12 : vector<1x128xf32>
    %14 = arith.addf %9, %13 : vector<1x128xf32>
    %c0_9 = arith.constant 0 : index
    %15 = memref.load %arg4[%c0_9] : memref<1xf32, #tpu.memory_space<smem>>
    %16 = vector.broadcast %15 : f32 to vector<1x128xf32>
    %17 = arith.addf %14, %16 : vector<1x128xf32>
    %c0_10 = arith.constant 0 : index
    %c0_11 = arith.constant 0 : index
    %18 = vector.load %arg5[%c0_10, %c0_11] : memref<1x128xf32, #tpu.memory_space<vmem>>, vector<1x128xf32>
    tpu.vector_store %arg5[%c0_10, %c0_11], %17 {strides = array<i32>} : memref<1x128xf32, #tpu.memory_space<vmem>>, vector<1x128xf32>,
    return
  }
  func.func @transform_0(%arg0: i32) -> (i32, i32) {
    %c0_i32 = arith.constant 0 : i32
    %c0_i32_0 = arith.constant 0 : i32
    return %c0_i32, %arg0 : i32, i32
  }
  func.func @transform_1(%arg0: i32) -> (i32, i32) {
    %c0_i32 = arith.constant 0 : i32
    %c0_i32_0 = arith.constant 0 : i32
    return %c0_i32, %arg0 : i32, i32
  }
  func.func @transform_2(%arg0: i32) -> i32 {
    %c0_i32 = arith.constant 0 : i32
    %c0_i32_0 = arith.constant 0 : i32
    return %c0_i32 : i32
  }
  func.func @transform_3(%arg0: i32) -> i32 {
    %c0_i32 = arith.constant 0 : i32
    %c0_i32_0 = arith.constant 0 : i32
    return %c0_i32 : i32
  }
  func.func @transform_4(%arg0: i32) -> (i32, i32) {
    %c0_i32 = arith.constant 0 : i32
    %c0_i32_0 = arith.constant 0 : i32
    return %c0_i32, %arg0 : i32, i32
  }
}

</mosaic_0001>

<bundles_post_ra>
// kernel: tpu_custom_call.1
= control target key start
LH: loop header
LB: loop body
LE: loop exit
PB: predicated region body
PF: predicated region fallthrough
CT: control target
= control target key end

     0   :  { %10 = vsyncpa [#allocation4], 0  ;;  %s209_s0 = inlined_call_operand.hbm [shape: f32[3,8], index: 0, kind: input, shape index: {}]   ;;  %s210_s1 = inlined_call_operand.vmem [shape: f32[2,8], index: 1, kind: input, shape index: {}]   ;;  %s211_s2 = inlined_call_operand.vmem [shape: f32[2], index: 2, kind: input, shape index: {}]   ;;  %s212_s3 = inlined_call_operand.<no memory space> [shape: f32[1], index: 3, kind: input, shape index: {}]   ;;  %s213_s4 = inlined_call_operand.hbm [shape: f32[1,128], index: 4, kind: output, shape index: {}]  }
   0x1   :  { %11 = vsyncpa [#allocation6], 0 }
   0x2   :  { %12 = vsyncpa [#allocation5], 0  ;;  %s31_s17 = sshll.u32 %s211_s2, 4  ;;  %s145_s18 = smov [#allocation3]   ;;  %s32_s17 = int_to_ptr.vmem [resolvable:$true] %s31_s17 }
   0x3   :  { %s19_s19 = sshll.u32 %s145_s18, 4  ;;  %s83_s22 = scalar_lea.hbm %s209_s0, 64  ;;  %s20_s19 = int_to_ptr.vmem [resolvable:$true] %s19_s19 }
   0x4   :  { %p84_p0 = scmp.ne.s32.totalorder %s209_s0, %s83_s22  ;;  %p87_p1 = scmp.lt.u32.totalorder %s83_s22, %s209_s0 }
   0x6   :  { %p89_p2 = pnand %p87_p1, %p84_p0 }
   0x8   :  { %92 = shalt.err (!%p89_p2)
}
   0x9   :  { %s93_s27 = scalar_lea.vmem %s20_s19, 64  ;;  %p98_p4 = scmp.lt.s32.totalorder %s20_s19, %s20_s19 }
   0xa   :  { %p94_p3 = scmp.ne.s32.totalorder %s20_s19, %s93_s27  ;;  %p99_p5 = scmp.lt.s32.totalorder %s93_s27, %s93_s27 }
   0xc   :  { %p100_p6 = por %p99_p5, %p98_p4 }
   0xe   :  { %p101_p7 = pnand %p100_p6, %p94_p3 }
  0x10   :  { %104 = shalt.err (!%p101_p7)
}
  0x11   :  { %22 = dma.hbm_to_vmem [thread:$0]  %s209_s0, 64, %s20_s19, [#allocation4]  }
  0x12   :  { %s105_s29 = scalar_lea.vmem %s32_s17, 16  ;;  %p110_p9 = scmp.lt.s32.totalorder %s32_s17, %s32_s17 }
  0x13   :  { %p106_p8 = scmp.ne.s32.totalorder %s32_s17, %s105_s29  ;;  %p111_p10 = scmp.lt.s32.totalorder %s105_s29, %s105_s29 }
  0x15   :  { %p112_p11 = por %p111_p10, %p110_p9 }
  0x17   :  { %p113_p12 = pnand %p112_p11, %p106_p8 }
  0x19   :  { %116 = shalt.err (!%p113_p12)
}
  0x1a   :  { %s146_s30 = smov [#allocation7]  }
  0x1b   :  { %34 = dma.vmem_to_smem %s32_s17, 16, %s146_s30, [#allocation6]  }
  0x1c   :  { %139 = dma.done.wait [#allocation4], 64  }
  0x1d   :  { %140 = vsyncadd [#allocation4], 4294967232 }
  0x1e   :  { %141 = dma.done.wait [#allocation6], 16  }
  0x1f   :  { %142 = vsyncadd [#allocation6], 4294967280 }
  0x20   :  { %43 = sfence }
  0x21   :  { %v44_v0 = vld [vmem:[#allocation3] sm:$0x1]  ;;  %v45_v1 = vld [vmem:[#allocation3 + $0x1] sm:$0x1]  ;;  %s50_s5 = sld [smem:[#allocation7]]  ;;  %s79_s6 = sld [smem:[#allocation7 + $0x1]]  ;;  %v60_v12 = vstv %s212_s3 }
  0x22   :  { %v46_v2 = vadd.f32 %v45_v1, %v44_v0  ;;  %v47_v3 = vld [vmem:[#allocation3 + $0x2] sm:$0x1]  ;;  %v49_v4 = vld [vmem:[%s210_s1] sm:$0x1]  ;;  %v54_v6 = vld [vmem:[%s210_s1 + $0x1] sm:$0x1] }
  0x23   :  { %s147_s12 = smov [#allocation8]  }
  0x24   :  { %v48_v5 = vadd.f32 %v47_v3, %v46_v2  ;;  %s69_s13 = sshll.u32 %s147_s12, 4  ;;  %s70_s13 = int_to_ptr.vmem [resolvable:$true] %s69_s13 }
  0x25   :  { %s117_s14 = scalar_lea.vmem %s70_s13, 16  ;;  %s121_s15 = scalar_lea.vmem %s70_s13, 32 }
  0x26   :  { %p118_p13 = scmp.ne.s32.totalorder %s70_s13, %s117_s14  ;;  %p122_p0 = scmp.lt.s32.totalorder %s70_s13, %s70_s13 }
  0x27   :  { %v51_v7 = vstv %s50_s5  ;;  %v56_v9 = vstv %s79_s6  ;;  %p123_p1 = scmp.lt.s32.totalorder %s121_s15, %s117_s14 }
  0x28   :  { %v52_v8 = vmul.f32 %v51_v7, %v49_v4  ;;  %v57_v10 = vmul.f32 %v56_v9, %v54_v6 }
  0x29   :  { %p124_p2 = por %p123_p1, %p122_p0 }
  0x2a   :  { %v53_v11 = vadd.f32 %v52_v8, %v48_v5 }
  0x2b   :  { %p125_p3 = pnand %p124_p2, %p118_p13 }
  0x2c   :  { %v58_v13 = vadd.f32 %v57_v10, %v53_v11 }
  0x2e   :  { %v61_v14 = vadd.f32 %v60_v12, %v58_v13 }
  0x30   :  { %62 = vst [vmem:[#allocation8] sm:$0x1] %v61_v14 }
  0x31   :  { %128 = shalt.err (!%p125_p3)
}
  0x32   :  { %s129_s17 = scalar_lea.hbm %s213_s4, 16 }
  0x33   :  { %p130_p4 = scmp.ne.s32.totalorder %s213_s4, %s129_s17  ;;  %p133_p5 = scmp.lt.u32.totalorder %s129_s17, %s213_s4 }
  0x35   :  { %p135_p6 = pnand %p133_p5, %p130_p4 }
  0x37   :  { %138 = shalt.err (!%p135_p6)
}
  0x38   :  { %72 = dma.vmem_to_hbm [thread:$0]  %s70_s13, 16, %s213_s4, [#allocation5]  }
  0x39   :  { %143 = dma.done.wait [#allocation5], 16  }
  0x3a   :  { %144 = vsyncadd [#allocation5], 4294967280 }
  0x3b   :  { %76 = vsyncpa [#allocation4], 1 }
  0x3c   :  { %77 = vsyncpa [#allocation5], 1 }
  0x3d   :  { %78 = vsyncpa [#allocation6], 1 }

</bundles_post_ra>
